<compile_context>
chip_gen: v6e
topology: v6e:2x2x1
jax: 0.10.0
libtpu: 0.0.40
codegen_flags: <defaults>
</compile_context>

<pallas_src>
import functools

import jax
import jax.numpy as jnp
from jax.experimental import pallas as pl
from jax.experimental.pallas import tpu as pltpu

_LANE = 128


def _solar_cell_kernel(xT_ref, w1T_ref, b1_ref, w2T_ref, b2_ref, out_ref, *,
                       two_class):
    # fc1: (hidden, in) @ (in, tb) -> (hidden, tb); bf16 operands, f32 accumulate.
    h = jnp.dot(w1T_ref[...], xT_ref[...],
                preferred_element_type=jnp.float32) + b1_ref[...]
    h = jnp.maximum(h, 0.0)
    # fc2: (out, hidden) @ (hidden, tb) -> (out, tb).
    logits = jnp.dot(w2T_ref[...], h.astype(w2T_ref.dtype),
                     preferred_element_type=jnp.float32) + b2_ref[...]
    if two_class:
        # softmax over 2 classes == sigmoid of the logit difference.
        # Exact normalization (p0 + p1 == 1), no cross-sublane reductions.
        diff = logits[1:2, :] - logits[0:1, :]          # (1, tb)
        p1 = 1.0 / (1.0 + jnp.exp(-diff))               # EUP exp + reciprocal
        p0 = 1.0 - p1
        row = jax.lax.broadcasted_iota(jnp.int32, out_ref.shape, 0)
        out_ref[...] = jnp.where(row == 0, p0, p1)
    else:
        # General numerically-stable softmax over the class (sublane) axis.
        m = jnp.max(logits, axis=0, keepdims=True)
        e = jnp.exp(logits - m)
        out_ref[...] = e * pl.reciprocal(jnp.sum(e, axis=0, keepdims=True),
                                         approx=False)


def reference_forward(x_smiles, x_homo_lumo, params):
    """Pure-JAX f32 reference of the PyTorch forward (also the fast path)."""
    w1, b1, w2, b2 = params
    x = jnp.concatenate([x_smiles, x_homo_lumo], axis=1)
    h = jnp.maximum(x @ w1 + b1, 0.0)
    logits = h @ w2 + b2
    return jax.nn.softmax(logits, axis=1)


def solar_cell_classifier(x_smiles, x_homo_lumo, params, *,
                          max_block_batch=2048, small_batch_threshold=256):
    """Forward pass. params = (w1, b1, w2, b2) with w* shaped (in, out)."""
    batch = x_smiles.shape[0]

    # Small-batch fast path: fixed pallas_call launch + padding cost dwarfs the
    # tiny amount of real work; XLA's fused path is strictly faster here.
    if batch <= small_batch_threshold:
        return reference_forward(x_smiles, x_homo_lumo, params)

    w1, b1, w2, b2 = params
    x = jnp.concatenate([x_smiles, x_homo_lumo], axis=1)
    input_dim = x.shape[1]
    hidden_dim = w1.shape[1]
    output_dim = w2.shape[1]

    # Transposed, batch-on-lanes layout; bf16 MXU operands, f32 biases.
    x_t = x.astype(jnp.bfloat16).T                       # (input_dim, batch)
    w1_t = w1.astype(jnp.bfloat16).T                     # (hidden, input)
    w2_t = w2.astype(jnp.bfloat16).T                     # (output, hidden)
    b1_c = b1.astype(jnp.float32).reshape(hidden_dim, 1)
    b2_c = b2.astype(jnp.float32).reshape(output_dim, 1)

    # Batch tile: multiple of 128 lanes, capped at max_block_batch, and aiming
    # for >=2 grid steps so both v7x TensorCores get work.
    max_block_batch = max(_LANE, (max_block_batch // _LANE) * _LANE)
    half = pl.cdiv(pl.cdiv(batch, 2), _LANE) * _LANE
    tb = max(_LANE, min(max_block_batch, half))
    padded = pl.cdiv(batch, tb) * tb
    if padded != batch:
        x_t = jnp.pad(x_t, ((0, 0), (0, padded - batch)))

    kernel = functools.partial(_solar_cell_kernel, two_class=(output_dim == 2))

    out_t = pl.pallas_call(
        kernel,
        out_shape=jax.ShapeDtypeStruct((output_dim, padded), jnp.float32),
        grid=(padded // tb,),
        in_specs=[
            pl.BlockSpec((input_dim, tb), lambda i: (0, i)),
            # Weights/biases: constant block index -> DMA'd once, VMEM-resident.
            pl.BlockSpec((hidden_dim, input_dim), lambda i: (0, 0)),
            pl.BlockSpec((hidden_dim, 1), lambda i: (0, 0)),
            pl.BlockSpec((output_dim, hidden_dim), lambda i: (0, 0)),
            pl.BlockSpec((output_dim, 1), lambda i: (0, 0)),
        ],
        out_specs=pl.BlockSpec((output_dim, tb), lambda i: (0, i)),
        compiler_params=pltpu.CompilerParams(
            dimension_semantics=("parallel",)),
    )(x_t, w1_t, b1_c, w2_t, b2_c)

    # Back to the PyTorch (batch, classes) layout.
    return out_t[:, :batch].T


def init_params(key, fp_dim, hl_dim, hidden_dim, output_dim):
    """Deterministic init mimicking nn.Linear (uniform +/- 1/sqrt(fan_in)), f32."""
    input_dim = fp_dim + hl_dim
    k1, k2, k3, k4 = jax.random.split(key, 4)
    bound1 = 1.0 / jnp.sqrt(input_dim)
    bound2 = 1.0 / jnp.sqrt(hidden_dim)
    w1 = jax.random.uniform(k1, (input_dim, hidden_dim), jnp.float32,
                            -bound1, bound1)
    b1 = jax.random.uniform(k2, (1, hidden_dim), jnp.float32, -bound1, bound1)
    w2 = jax.random.uniform(k3, (hidden_dim, output_dim), jnp.float32,
                            -bound2, bound2)
    b2 = jax.random.uniform(k4, (1, output_dim), jnp.float32, -bound2, bound2)
    return (w1, b1, w2, b2)


if __name__ == "__main__":
    # Shapes consistent with the module: 2 SMILES samples, fingerprint dim 30
    # (+2 HOMO/LUMO features => input_dim=32), hidden_dim=64, output_dim=2.
    batch, fp_dim, hl_dim, hidden_dim, output_dim = 2, 30, 2, 64, 2

    key = jax.random.PRNGKey(0)
    k_params, k_fp, k_hl, k_fp2, k_hl2 = jax.random.split(key, 5)

    # Synthetic stand-in for smiles_to_fingerprint (RDKit not available):
    # binary fingerprint bits.  # TODO(synk): real RDKFingerprint featurization.
    x_smiles = (jax.random.uniform(k_fp, (batch, fp_dim)) > 0.5).astype(jnp.float32)
    x_homo_lumo = jax.random.normal(k_hl, (batch, hl_dim), jnp.float32)

    params = init_params(k_params, fp_dim, hl_dim, hidden_dim, output_dim)
    ref = reference_forward(x_smiles, x_homo_lumo, params)

    # 1) Force the Pallas kernel at the module's small batch (grid = 1 step).
    out = solar_cell_classifier(x_smiles, x_homo_lumo, params,
                                small_batch_threshold=0)
    out = jax.block_until_ready(out)
    assert out.shape == (batch, output_dim)
    assert jnp.allclose(out, ref, atol=2e-2, rtol=2e-2)         # bf16 matmul tol
    assert jnp.allclose(jnp.sum(out, axis=1), 1.0, atol=1e-5)   # exact sigmoid norm

    # 2) Default path (small-batch fast path, no pallas_call) matches too.
    out_fast = jax.block_until_ready(
        solar_cell_classifier(x_smiles, x_homo_lumo, params))
    assert jnp.allclose(out_fast, ref, atol=1e-5, rtol=1e-5)

    # 3) Larger batch exercising padding + a >=2-step grid (v7x both-TC path).
    big = 300
    xs_big = (jax.random.uniform(k_fp2, (big, fp_dim)) > 0.5).astype(jnp.float32)
    xh_big = jax.random.normal(k_hl2, (big, hl_dim), jnp.float32)
    out_big = jax.block_until_ready(
        solar_cell_classifier(xs_big, xh_big, params, small_batch_threshold=0))
    ref_big = reference_forward(xs_big, xh_big, params)
    assert out_big.shape == (big, output_dim)
    assert jnp.allclose(out_big, ref_big, atol=2e-2, rtol=2e-2)
    assert jnp.allclose(jnp.sum(out_big, axis=1), 1.0, atol=1e-5)

    print("KERNEL_OK")
</pallas_src>

<mosaic_0001>
module attributes {stable_mosaic.version = 11 : i64} {
  func.func @_solar_cell_kernel(%arg0: i32, %arg1: memref<32x128xbf16, #tpu.memory_space<vmem>>, %arg2: memref<64x32xbf16, #tpu.memory_space<vmem>>, %arg3: memref<64x1xf32, #tpu.memory_space<vmem>>, %arg4: memref<2x64xbf16, #tpu.memory_space<vmem>>, %arg5: memref<2x1xf32, #tpu.memory_space<vmem>>, %arg6: memref<2x128xf32, #tpu.memory_space<vmem>>) attributes {dimension_semantics = [#tpu.dimension_semantics<parallel>], iteration_bounds = array<i64: 1>, scalar_prefetch = 0 : i64, scratch_operands = 0 : i64, tpu.core_type = #tpu.core_type<tc>, window_params = [{transform_indices = @transform_0, window_bounds = array<i64: 32, 128>}, {pipeline_mode = #tpu.pipeline_mode<synchronous>, transform_indices = @transform_1, window_bounds = array<i64: 64, 32>}, {pipeline_mode = #tpu.pipeline_mode<synchronous>, transform_indices = @transform_2, window_bounds = array<i64: 64, 1>}, {pipeline_mode = #tpu.pipeline_mode<synchronous>, transform_indices = @transform_3, window_bounds = array<i64: 2, 64>}, {pipeline_mode = #tpu.pipeline_mode<synchronous>, transform_indices = @transform_4, window_bounds = array<i64: 2, 1>}, {transform_indices = @transform_5, window_bounds = array<i64: 2, 128>}]} {
    %c0 = arith.constant 0 : index
    %c0_0 = arith.constant 0 : index
    %0 = vector.load %arg2[%c0, %c0_0] : memref<64x32xbf16, #tpu.memory_space<vmem>>, vector<64x32xbf16>
    %c0_1 = arith.constant 0 : index
    %c0_2 = arith.constant 0 : index
    %1 = vector.load %arg1[%c0_1, %c0_2] : memref<32x128xbf16, #tpu.memory_space<vmem>>, vector<32x128xbf16>
    %cst = arith.constant dense<0.000000e+00> : vector<64x128xf32>
    %2 = tpu.matmul %0, %1, %cst {dimension_numbers = #tpu.dot_dimension_numbers<[1], [0], [0], [1], [0, 0, 1, 1], [], []>} : vector<64x32xbf16>, vector<32x128xbf16>, vector<64x128xf32> -> vector<64x128xf32>
    %c0_3 = arith.constant 0 : index
    %c0_4 = arith.constant 0 : index
    %3 = vector.load %arg3[%c0_3, %c0_4] : memref<64x1xf32, #tpu.memory_space<vmem>>, vector<64x1xf32>
    %4 = vector.broadcast %3 : vector<64x1xf32> to vector<64x128xf32>
    %5 = arith.addf %2, %4 : vector<64x128xf32>
    %cst_5 = arith.constant 0.000000e+00 : f32
    %6 = vector.broadcast %cst_5 : f32 to vector<64x128xf32>
    %7 = arith.maximumf %5, %6 : vector<64x128xf32>
    %c0_6 = arith.constant 0 : index
    %c0_7 = arith.constant 0 : index
    %8 = vector.load %arg4[%c0_6, %c0_7] : memref<2x64xbf16, #tpu.memory_space<vmem>>, vector<2x64xbf16>
    %9 = arith.truncf %7 : vector<64x128xf32> to vector<64x128xbf16>
    %cst_8 = arith.constant dense<0.000000e+00> : vector<2x128xf32>
    %10 = tpu.matmul %8, %9, %cst_8 {dimension_numbers = #tpu.dot_dimension_numbers<[1], [0], [0], [1], [0, 0, 1, 1], [], []>} : vector<2x64xbf16>, vector<64x128xbf16>, vector<2x128xf32> -> vector<2x128xf32>
    %c0_9 = arith.constant 0 : index
    %c0_10 = arith.constant 0 : index
    %11 = vector.load %arg5[%c0_9, %c0_10] : memref<2x1xf32, #tpu.memory_space<vmem>>, vector<2x1xf32>
    %12 = vector.broadcast %11 : vector<2x1xf32> to vector<2x128xf32>
    %13 = arith.addf %10, %12 : vector<2x128xf32>
    %14 = vector.extract_strided_slice %13 {offsets = [1, 0], sizes = [1, 128], strides = [1, 1]} : vector<2x128xf32> to vector<1x128xf32>
    %15 = vector.extract_strided_slice %13 {offsets = [0, 0], sizes = [1, 128], strides = [1, 1]} : vector<2x128xf32> to vector<1x128xf32>
    %16 = arith.subf %14, %15 : vector<1x128xf32>
    %cst_11 = arith.constant 0.000000e+00 : f32
    %17 = vector.broadcast %cst_11 : f32 to vector<1x128xf32>
    %18 = arith.subf %17, %16 : vector<1x128xf32>
    %19 = math.exp %18 : vector<1x128xf32>
    %cst_12 = arith.constant 1.000000e+00 : f32
    %20 = vector.broadcast %cst_12 : f32 to vector<1x128xf32>
    %21 = arith.addf %20, %19 : vector<1x128xf32>
    %cst_13 = arith.constant 1.000000e+00 : f32
    %22 = vector.broadcast %cst_13 : f32 to vector<1x128xf32>
    %23 = arith.divf %22, %21 : vector<1x128xf32>
    %cst_14 = arith.constant 1.000000e+00 : f32
    %24 = vector.broadcast %cst_14 : f32 to vector<1x128xf32>
    %25 = arith.subf %24, %23 : vector<1x128xf32>
    %26 = tpu.iota {dimensions = array<i32: 0>} : vector<2x128xi32>
    %c0_i32 = arith.constant 0 : i32
    %27 = vector.broadcast %c0_i32 : i32 to vector<2x128xi32>
    %28 = arith.cmpi eq, %26, %27 : vector<2x128xi32>
    %29 = vector.shape_cast %25 : vector<1x128xf32> to vector<1x128xf32>
    %30 = vector.broadcast %29 : vector<1x128xf32> to vector<2x128xf32>
    %31 = vector.shape_cast %23 : vector<1x128xf32> to vector<1x128xf32>
    %32 = vector.broadcast %31 : vector<1x128xf32> to vector<2x128xf32>
    %33 = arith.select %28, %30, %32 : vector<2x128xi1>, vector<2x128xf32>
    %c0_15 = arith.constant 0 : index
    %c0_16 = arith.constant 0 : index
    %34 = vector.load %arg6[%c0_15, %c0_16] : memref<2x128xf32, #tpu.memory_space<vmem>>, vector<2x128xf32>
    tpu.vector_store %arg6[%c0_15, %c0_16], %33 {strides = array<i32>} : memref<2x128xf32, #tpu.memory_space<vmem>>, vector<2x128xf32>,
    return
  }
  func.func @transform_0(%arg0: i32) -> (i32, i32) {
    %c0_i32 = arith.constant 0 : i32
    %c0_i32_0 = arith.constant 0 : i32
    return %c0_i32, %arg0 : i32, i32
  }
  func.func @transform_1(%arg0: i32) -> (i32, i32) {
    %c0_i32 = arith.constant 0 : i32
    %c0_i32_0 = arith.constant 0 : i32
    %c0_i32_1 = arith.constant 0 : i32
    return %c0_i32, %c0_i32_0 : i32, i32
  }
  func.func @transform_2(%arg0: i32) -> (i32, i32) {
    %c0_i32 = arith.constant 0 : i32
    %c0_i32_0 = arith.constant 0 : i32
    %c0_i32_1 = arith.constant 0 : i32
    return %c0_i32, %c0_i32_0 : i32, i32
  }
  func.func @transform_3(%arg0: i32) -> (i32, i32) {
    %c0_i32 = arith.constant 0 : i32
    %c0_i32_0 = arith.constant 0 : i32
    %c0_i32_1 = arith.constant 0 : i32
    return %c0_i32, %c0_i32_0 : i32, i32
  }
  func.func @transform_4(%arg0: i32) -> (i32, i32) {
    %c0_i32 = arith.constant 0 : i32
    %c0_i32_0 = arith.constant 0 : i32
    %c0_i32_1 = arith.constant 0 : i32
    return %c0_i32, %c0_i32_0 : i32, i32
  }
  func.func @transform_5(%arg0: i32) -> (i32, i32) {
    %c0_i32 = arith.constant 0 : i32
    %c0_i32_0 = arith.constant 0 : i32
    return %c0_i32, %arg0 : i32, i32
  }
}

</mosaic_0001>

<bundles_post_ra>
// kernel: tpu_custom_call.1
= control target key start
LH: loop header
LB: loop body
LE: loop exit
PB: predicated region body
PF: predicated region fallthrough
CT: control target
= control target key end

     0   :  { %vm114_vm0 = vcmask 261120   ;;  %v377_v3 = vmov 0   ;;  %s466_s0 = inlined_call_operand.vmem [shape: bf16[32,128], index: 0, kind: input, shape index: {}]   ;;  %s467_s1 = inlined_call_operand.vmem [shape: bf16[64,32], index: 1, kind: input, shape index: {}]   ;;  %s468_s2 = inlined_call_operand.vmem [shape: f32[64,1], index: 2, kind: input, shape index: {}]   ;;  %s469_s3 = inlined_call_operand.vmem [shape: bf16[2,64], index: 3, kind: input, shape index: {}]   ;;  %s470_s4 = inlined_call_operand.vmem [shape: f32[2,1], index: 4, kind: input, shape index: {}]   ;;  %s471_s5 = inlined_call_operand.hbm [shape: f32[2,128], index: 5, kind: output, shape index: {}]  }
   0x1   :  { %v345_v0 = vld [vmem:[%s466_s0 + $0x8] sm:$0xff]   ;;  %v346_v1 = vld [vmem:[%s466_s0] sm:$0xff]   ;;  %343 = vset.pattern.permute.xlu0 %v377_v3  ;;  %344 = vset.pattern.permute.xlu1 %v377_v3  ;;  %v40_v5 = vld [vmem:[%s468_s2 + $0x30] sm:$0xff] }
   0x2   :  { %315 = vmatprep.subr.bf16.mxu0 %v345_v0  ;;  %v347_v2 = vld [vmem:[%s467_s1] sm:$0xff]   ;;  %v348_v4 = vld [vmem:[%s467_s1 + $0x8] sm:$0xff]   ;;  %v349_v7 = vld [vmem:[%s467_s1 + $0x10] sm:$0xff]   ;;  %74 = vperm.xlu0 %343, %v40_v5  }
   0x3   :  { %316 = vmatpush3.bf16.msra.mxu0 %v345_v0  ;;  %319 = vmatprep.mubr.msk.bf16.mxu0 %vm114_vm0, %v347_v2  ;;  %v38_v6 = vld [vmem:[%s468_s2 + $0x20] sm:$0xff]  ;;  %v41_v8 = vld [vmem:[%s468_s2 + $0x38] sm:$0xff]  ;;  %v39_v9 = vld [vmem:[%s468_s2 + $0x28] sm:$0xff] }
   0x4   :  { %317 = vmatprep.subr.bf16.mxu0 %v346_v1  ;;  %64 = vperm.xlu1 %344, %v38_v6  }
   0x7   :  { %318 = vmatpush3.bf16.msra.mxu0 %v346_v1 }
   0x8   :  { %10 = vsyncpa [#allocation3], 0  ;;  %79 = vperm.xlu0 %343, %v41_v8   ;;  %69 = vperm.xlu1 %344, %v39_v9   ;;  %v36_v10 = vld [vmem:[%s468_s2 + $0x10] sm:$0xff]  ;;  %v37_v11 = vld [vmem:[%s468_s2 + $0x18] sm:$0xff]  ;;  %v378_v16 = vmov 0.0   ;;  %vm379_vm1 = vmmov 0   ;;  %v266_v2 = vlaneseq }
   0x9   :  { %v350_v12 = vld [vmem:[%s467_s1 + $0x18] sm:$0xff]   ;;  %v34_v13 = vld [vmem:[%s468_s2] sm:$0xff]  ;;  %v35_v14 = vld [vmem:[%s468_s2 + $0x8] sm:$0xff]  ;;  %327 = vmatprep.subr.bf16.mxu1 %v378_v16  ;;  %335 = vmatprep.mubr.msk.bf16.mxu1 %vm379_vm1, %v378_v16  ;;  %vm211_vm2 = vcmask 523264  }
   0xa   :  { %320 = vmatmul.mubr.msk.bf16.vlgmr.msra.gmra.mxu0 %vm114_vm0, %v348_v4  ;;  %v205_v15 = vld [vmem:[%s470_s4] sm:$0x3]  ;;  %v267_v3 = vshrl.u32 %v266_v2, 7 }
   0xb   :  { %323 = vmatprep.mubr.msk.bf16.mxu0 %vm114_vm0, %v349_v7  ;;  %v200_v53 = vld [vmem:[%s469_s3] sm:$0x1]  ;;  %s380_s3 = smov [#allocation2]  }
   0xc   :  { %54 = vperm.xlu0 %343, %v36_v10   ;;  %59 = vperm.xlu1 %344, %v37_v11   ;;  %v271_v4 = vsub.s32 1, %v267_v3  ;;  %s285_s4 = sshll.u32 %s380_s3, 4  ;;  %vm268_vm3 = vcmp.eq.s32.totalorder %v267_v3, 0  ;;  %s286_s4 = int_to_ptr.vmem [resolvable:$true] %s285_s4 }
   0xd   :  { %s355_s22 = scalar_lea.vmem %s286_s4, 32  ;;  %p360_p1 = scmp.lt.s32.totalorder %s286_s4, %s286_s4 }
   0xe   :  { %p356_p0 = scmp.ne.s32.totalorder %s286_s4, %s355_s22  ;;  %p361_p2 = scmp.lt.s32.totalorder %s355_s22, %s355_s22 }
  0x10   :  { %44 = vperm.xlu0 %343, %v34_v13   ;;  %49 = vperm.xlu1 %344, %v35_v14   ;;  %p362_p3 = por %p361_p2, %p360_p1 }
  0x12   :  { %324 = vmatmul.mubr.msk.bf16.gmra.mxu0 %vm114_vm0, %v350_v12  ;;  %p363_p4 = pnand %p362_p3, %p356_p0 }
  0x14   :  { %208 = vperm.xlu0 %343, %v205_v15  }
  0x7d   :  { %v75_v19 = vpop.permute.xlu0 %74 }
  0x7f   :  { %v65_v17 = vpop.permute.xlu1 %64 }
  0x83   :  { %v70_v22 = vpop.permute.xlu1 %69  ;;  %v80_v24 = vpop.permute.xlu0 %79 }
  0x87   :  { %v60_v28 = vpop.permute.xlu1 %59  ;;  %v55_v31 = vpop.permute.xlu0 %54 }
  0x8b   :  { %v50_v40 = vpop.permute.xlu1 %49  ;;  %v45_v43 = vpop.permute.xlu0 %44 }
  0x8f   :  { %v209_v54 = vpop.permute.xlu0 %208 }
  0xca   :  { %v321_v18 = vpop.f32.mrf.mxu0 }
  0xcb   :  { %v170_v41 = vadd.f32 %v321_v18, %v55_v31 }
  0xcc   :  { %v161_v20 = vpop.f32.mrf.mxu0 }
  0xcd   :  { %v194_v47 = vmax.f32 %v170_v41, 0.0  ;;  %v162_v48 = vadd.f32 %v161_v20, %v45_v43 }
  0xce   :  { %v322_v21 = vpop.f32.mrf.mxu0 }
  0xcf   :  { %v173_v37 = vadd.f32 %v322_v21, %v60_v28  ;;  %v192_v51 = vmax.f32 %v162_v48, 0.0 }
  0xd0   :  { %v164_v23 = vpop.f32.mrf.mxu0 }
  0xd1   :  { %v195_v44 = vmax.f32 %v173_v37, 0.0  ;;  %v165_v45 = vadd.f32 %v164_v23, %v50_v40 }
  0xd2   :  { %v325_v25 = vpop.f32.mrf.mxu0 }
  0xd3   :  { %v186_v27 = vadd.f32 %v325_v25, %v75_v19  ;;  %v202_v49 = vpack.c.bf16 %v195_v44, %v194_v47  ;;  %v193_v50 = vmax.f32 %v165_v45, 0.0 }
  0xd4   :  { %v177_v26 = vpop.f32.mrf.mxu0 }
  0xd5   :  { %v198_v33 = vmax.f32 %v186_v27, 0.0  ;;  %v178_v34 = vadd.f32 %v177_v26, %v65_v17  ;;  %v201_v52 = vpack.c.bf16 %v193_v50, %v192_v51 }
  0xd6   :  { %v326_v29 = vpop.f32.mrf.mxu0 }
  0xd7   :  { %v189_v30 = vadd.f32 %v326_v29, %v80_v24  ;;  %v196_v42 = vmax.f32 %v178_v34, 0.0 }
  0xd8   :  { %v180_v32 = vpop.f32.mrf.mxu0 }
  0xd9   :  { %v199_v35 = vmax.f32 %v189_v30, 0.0  ;;  %v181_v36 = vadd.f32 %v180_v32, %v70_v22 }
  0xdb   :  { %v197_v38 = vmax.f32 %v181_v36, 0.0  ;;  %v204_v39 = vpack.c.bf16 %v199_v35, %v198_v33 }
  0xdd   :  { %328 = vmatpush3.bf16.msra.mxu1 %v204_v39  ;;  %v203_v46 = vpack.c.bf16 %v197_v38, %v196_v42 }
  0xde   :  { %329 = vmatprep.subr.bf16.mxu1 %v378_v16 }
  0xe1   :  { %330 = vmatpush3.bf16.msra.mxu1 %v203_v46 }
  0xe2   :  { %331 = vmatprep.subr.bf16.mxu1 %v378_v16 }
  0xe5   :  { %332 = vmatpush3.bf16.msra.mxu1 %v202_v49 }
  0xe6   :  { %333 = vmatprep.subr.bf16.mxu1 %v378_v16 }
  0xe9   :  { %334 = vmatpush3.bf16.msra.mxu1 %v201_v52 }
  0xec   :  { %336 = vmatmul.mubr.msk.bf16.vlgmr.msra.gmra.mxu1 %vm211_vm2, %v200_v53 }
 0x1ac   :  { %v249_v55 = vpop.f32.mrf.mxu1 }
 0x1ad   :  { %v250_v56 = vadd.f32 %v249_v55, %v209_v54 }
 0x1ae   :  { %v337_v57 = vpop.f32.mrf.mxu1 }
 0x1af   :  { %v256_v58 = vrot.slane %v250_v56, 7 }
 0x1b0   :  { %v252_v59 = vpop.f32.mrf.mxu1 }
 0x1b1   :  { %v258_v60 = vsub.f32 %v250_v56, %v256_v58 }
 0x1b2   :  { %v338_v61 = vpop.f32.mrf.mxu1 }
 0x1b3   :  { %v259_v62 = vsub.f32 0.0, %v258_v60 }
 0x1b5   :  { %v260_v63 = vmul.f32 1.442695, %v259_v62 }
 0x1b7   :  { %351 = vpow2.f32 %v260_v63 }
 0x1c4   :  { %v352_v0 = vpop.eup %351 }
 0x1c5   :  { %v262_v1 = vadd.f32 1.0, %v352_v0 }
 0x1c7   :  { %353 = vrcp.f32 %v262_v1 }
 0x1d4   :  { %v354_v5 = vpop.eup %353 }
 0x1d5   :  { %v265_v6 = vsub.f32 1.0, %v354_v5  ;;  %v276_v8 = vrot.slane %v354_v5, %v271_v4 }
 0x1d7   :  { %v272_v7 = vrot.slane %v265_v6, %v271_v4 }
 0x1d9   :  { %v277_v9 = vsel %vm268_vm3, %v272_v7, %v276_v8 }
 0x1da   :  { %278 = vst [vmem:[#allocation2] sm:$0x3] %v277_v9 }
 0x1db   :  { %366 = shalt.err (!%p363_p4)
}
 0x1dc   :  { %288 = dma.vmem_to_hbm [thread:$0]  %s286_s4, 32, %s471_s5, [#allocation3]  }
 0x1dd   :  { %375 = dma.done.wait [#allocation3], 32  }
 0x1de   :  { %376 = vsyncadd [#allocation3], 4294967264 }
 0x1df   :  { %292 = vsyncpa [#allocation3], 1 }

</bundles_post_ra>
